<compile_context>
chip_gen: v7x
topology: tpu7x:2x2x1
jax: 0.10.0
libtpu: 0.0.40
codegen_flags: <defaults>
</compile_context>

<pallas_src>
import functools
import math

import jax
import jax.numpy as jnp
from jax.experimental import pallas as pl
from jax.experimental.pallas import tpu as pltpu

_LANE = 128
_SUBLANE = 8
_ALIGN = _LANE * _SUBLANE  # 1024 elements


def _quantize_kernel(x_ref, o_ref, *, qp, inv_qp, use_mul, normalize):
    x = x_ref[...]
    if use_mul:
        # qp is an exact power of two -> x * (1/qp) is bit-exact vs x / qp.
        r = jnp.round(x * inv_qp)
    else:
        # Keep the true divide for arbitrary qp to preserve torch parity;
        # the kernel is DMA-bound so the divide is hidden under the copies.
        r = jnp.round(x / qp)
    if normalize:
        r = r * qp
    o_ref[...] = r.astype(o_ref.dtype)


def quantize_layer(x, qp: float = 0.5, normalize: bool = True,
                   row_tile: int = 4096, donate_input: bool = False):
    """Elementwise quantization matching QuantizeLayer.forward.

    x: any-shaped float array (e.g. NCHW). Returns same shape/dtype.
    row_tile=4096 -> 4096*128*4B = 2 MiB f32 blocks; double-buffered
    in+out = 8 MiB VMEM, safe on v5e/v6e/v7x default scoped VMEM.
    """
    orig_shape = x.shape
    orig_dtype = x.dtype
    n = x.size

    qp = float(qp)
    mant, _ = math.frexp(qp)
    use_mul = (mant == 0.5)        # exact power of two (covers the 0.5 default)
    inv_qp = 1.0 / qp

    # Flatten to a lane-dense slab. ravel/reshape of contiguous data is free;
    # the pad (and trailing slice) only happen when n is not a multiple of
    # 8*128 = 1024.
    x_flat = jnp.ravel(x)
    padded = pl.cdiv(n, _ALIGN) * _ALIGN
    needs_pad = padded != n
    if needs_pad:
        x_flat = jnp.pad(x_flat, (0, padded - n))
    rows = padded // _LANE
    x2d = x_flat.reshape(rows, _LANE)

    # Tile rows: cap at the actual row count, keep it a multiple of 8.
    tile = min(int(row_tile), rows)
    tile = max(_SUBLANE, (tile // _SUBLANE) * _SUBLANE)
    grid = (pl.cdiv(rows, tile),)   # ragged last block is masked by Pallas

    kernel = functools.partial(
        _quantize_kernel, qp=qp, inv_qp=inv_qp,
        use_mul=use_mul, normalize=bool(normalize))

    nbytes = n * jnp.dtype(orig_dtype).itemsize
    cost = pl.CostEstimate(flops=2 * n, transcendentals=0,
                           bytes_accessed=2 * nbytes)

    out2d = pl.pallas_call(
        kernel,
        out_shape=jax.ShapeDtypeStruct((rows, _LANE), orig_dtype),
        grid_spec=pltpu.PrefetchScalarGridSpec(
            num_scalar_prefetch=0,
            grid=grid,
            in_specs=[pl.BlockSpec((tile, _LANE), lambda i: (i, 0))],
            out_specs=pl.BlockSpec((tile, _LANE), lambda i: (i, 0)),
        ),
        compiler_params=pltpu.CompilerParams(
            dimension_semantics=("parallel",)),
        cost_estimate=cost,
        input_output_aliases={0: 0} if donate_input else {},
    )(x2d)

    if needs_pad:
        out_flat = out2d.reshape(-1)[:n]
    else:
        out_flat = out2d
    return out_flat.reshape(orig_shape)


if __name__ == "__main__":
    key = jax.random.PRNGKey(0)
    # Small NCHW input consistent with the (elementwise) module.
    x = jax.random.normal(key, (2, 4, 16, 16), dtype=jnp.float32) * 3.0

    qp = 0.5
    out = jax.block_until_ready(quantize_layer(x, qp=qp, normalize=True))
    ref = qp * jnp.round(x / qp)
    assert out.shape == x.shape and out.dtype == x.dtype
    assert jnp.allclose(out, ref), "mismatch vs reference (normalize=True)"

    # normalize=False path.
    out2 = jax.block_until_ready(quantize_layer(x, qp=qp, normalize=False))
    ref2 = jnp.round(x / qp)
    assert jnp.allclose(out2, ref2), "mismatch vs reference (normalize=False)"

    # Ragged size (exercises the masked partial block / alignment pad path)
    # and a non-power-of-two qp (exercises the exact-divide path).
    key2 = jax.random.PRNGKey(1)
    y = jax.random.normal(key2, (2, 3, 15, 17), dtype=jnp.float32) * 2.0
    qp2 = 0.3
    out3 = jax.block_until_ready(quantize_layer(y, qp=qp2, normalize=True))
    ref3 = qp2 * jnp.round(y / qp2)
    assert out3.shape == y.shape
    assert jnp.allclose(out3, ref3), "mismatch vs reference (ragged / qp=0.3)"

    print("KERNEL_OK")
</pallas_src>

<mosaic_0001>
module attributes {stable_mosaic.version = 11 : i64} {
  func.func @_quantize_kernel(%arg0: i32, %arg1: memref<16x128xf32, #tpu.memory_space<vmem>>, %arg2: memref<16x128xf32, #tpu.memory_space<vmem>>) attributes {dimension_semantics = [#tpu.dimension_semantics<parallel>], iteration_bounds = array<i64: 1>, scalar_prefetch = 0 : i64, scratch_operands = 0 : i64, tpu.core_type = #tpu.core_type<tc>, window_params = [{transform_indices = @transform_0, window_bounds = array<i64: 16, 128>}, {transform_indices = @transform_1, window_bounds = array<i64: 16, 128>}]} {
    %c0 = arith.constant 0 : index
    %c0_0 = arith.constant 0 : index
    %0 = vector.load %arg1[%c0, %c0_0] : memref<16x128xf32, #tpu.memory_space<vmem>>, vector<16x128xf32>
    %cst = arith.constant 2.000000e+00 : f32
    %1 = vector.broadcast %cst : f32 to vector<16x128xf32>
    %2 = arith.mulf %0, %1 : vector<16x128xf32>
    %3 = math.roundeven %2 : vector<16x128xf32>
    %cst_1 = arith.constant 5.000000e-01 : f32
    %4 = vector.broadcast %cst_1 : f32 to vector<16x128xf32>
    %5 = arith.mulf %3, %4 : vector<16x128xf32>
    %c0_2 = arith.constant 0 : index
    %c0_3 = arith.constant 0 : index
    %6 = vector.load %arg2[%c0_2, %c0_3] : memref<16x128xf32, #tpu.memory_space<vmem>>, vector<16x128xf32>
    tpu.vector_store %arg2[%c0_2, %c0_3], %5 {strides = array<i32>} : memref<16x128xf32, #tpu.memory_space<vmem>>, vector<16x128xf32>,
    return
  }
  func.func @transform_0(%arg0: i32) -> (i32, i32) {
    %c0_i32 = arith.constant 0 : i32
    %c0_i32_0 = arith.constant 0 : i32
    return %arg0, %c0_i32 : i32, i32
  }
  func.func @transform_1(%arg0: i32) -> (i32, i32) {
    %c0_i32 = arith.constant 0 : i32
    %c0_i32_0 = arith.constant 0 : i32
    return %arg0, %c0_i32 : i32, i32
  }
}

</mosaic_0001>

<bundles_post_ra>
// kernel: tpu_custom_call.1
= control target key start
LH: loop header
LB: loop body
LE: loop exit
PB: predicated region body
PF: predicated region fallthrough
CT: control target
= control target key end

     0   :  { %6 = vsyncpa [#allocation3], 0  ;;  %s148_s0 = inlined_call_operand.hbm [shape: f32[16,128], index: 0, kind: input, shape index: {}]   ;;  %s149_s1 = inlined_call_operand.hbm [shape: f32[16,128], index: 1, kind: output, shape index: {}]  }
   0x1   :  { %7 = vsyncpa [#allocation4], 0  ;;  %s104_s6 = smov [#allocation2]   ;;  %s56_s10 = scalar_lea.hbm %s148_s0, 256 }
   0x2   :  { %s13_s7 = sshll.u32 %s104_s6, 4  ;;  %p57_p0 = scmp.ne.s32.totalorder %s148_s0, %s56_s10  ;;  %s14_s7 = int_to_ptr.vmem [resolvable:$true] %s13_s7 }
   0x3   :  { %p60_p1 = scmp.lt.u32.totalorder %s56_s10, %s148_s0 }
   0x5   :  { %p62_p2 = pnand %p60_p1, %p57_p0 }
   0x7   :  { %65 = shalt.err (!%p62_p2)
}
   0x8   :  { %s66_s15 = scalar_lea.vmem %s14_s7, 256  ;;  %p71_p4 = scmp.lt.s32.totalorder %s14_s7, %s14_s7 }
   0x9   :  { %p67_p3 = scmp.ne.s32.totalorder %s14_s7, %s66_s15  ;;  %p72_p5 = scmp.lt.s32.totalorder %s66_s15, %s66_s15 }
   0xb   :  { %p73_p6 = por %p72_p5, %p71_p4 }
   0xd   :  { %p74_p7 = pnand %p73_p6, %p67_p3 }
   0xf   :  { %77 = shalt.err (!%p74_p7)
}
  0x10   :  { %s105_s16 = smov 128   ;;  %s106_s17 = smov 8  }
  0x11   :  { %19 = dma.hbm_to_vmem [thread:$0]  %s148_s0, 256, %s14_s7, [#allocation3], %s105_s16, %s105_s16, %s106_s17  }
  0x12   :  { %100 = dma.done.wait [#allocation3], 256  }
  0x13   :  { %101 = vsyncadd [#allocation3], 4294967040  ;;  %v23_v0 = vld [vmem:[#allocation2] sm:$0xff]  ;;  %v24_v1 = vld [vmem:[#allocation2 + $0x8] sm:$0xff]  ;;  %s107_s20 = smov [#allocation5]  }
  0x14   :  { %v25_v2 = vmul.f32 2.0, %v23_v0  ;;  %v26_v3 = vmul.f32 2.0, %v24_v1  ;;  %s38_s21 = sshll.u32 %s107_s20, 4  ;;  %s39_s21 = int_to_ptr.vmem [resolvable:$true] %s38_s21 }
  0x15   :  { %s78_s22 = scalar_lea.vmem %s39_s21, 256  ;;  %p83_p9 = scmp.lt.s32.totalorder %s39_s21, %s39_s21 }
  0x16   :  { %v50_v4 = vround.rtne.f32 %v25_v2  ;;  %v51_v5 = vround.rtne.f32 %v26_v3  ;;  %p79_p8 = scmp.ne.s32.totalorder %s39_s21, %s78_s22  ;;  %p84_p10 = scmp.lt.s32.totalorder %s78_s22, %s78_s22 }
  0x18   :  { %v29_v6 = vmul.f32 0.5, %v50_v4  ;;  %v30_v7 = vmul.f32 0.5, %v51_v5  ;;  %p85_p11 = por %p84_p10, %p83_p9 }
  0x1a   :  { %31 = vst [vmem:[#allocation5] sm:$0xff] %v29_v6  ;;  %32 = vst [vmem:[#allocation5 + $0x8] sm:$0xff] %v30_v7  ;;  %p86_p12 = pnand %p85_p11, %p79_p8 }
  0x1c   :  { %89 = shalt.err (!%p86_p12)
}
  0x1d   :  { %s90_s24 = scalar_lea.hbm %s149_s1, 256 }
  0x1e   :  { %p91_p13 = scmp.ne.s32.totalorder %s149_s1, %s90_s24  ;;  %p94_p0 = scmp.lt.u32.totalorder %s90_s24, %s149_s1 }
  0x20   :  { %p96_p1 = pnand %p94_p0, %p91_p13 }
  0x22   :  { %99 = shalt.err (!%p96_p1)
}
  0x23   :  { %44 = dma.vmem_to_hbm [thread:$0]  %s39_s21, 256, %s149_s1, [#allocation4], %s105_s16, %s105_s16, %s106_s17  }
  0x24   :  { %102 = dma.done.wait [#allocation4], 256  }
  0x25   :  { %103 = vsyncadd [#allocation4], 4294967040 }
  0x26   :  { %48 = vsyncpa [#allocation3], 1 }
  0x27   :  { %49 = vsyncpa [#allocation4], 1 }

</bundles_post_ra>
